<compile_context>
chip_gen: v5e
topology: v5e:2x2
jax: 0.10.0
libtpu: 0.0.40
codegen_flags: <defaults>
</compile_context>

<pallas_src>
import functools
import math

import jax
import jax.numpy as jnp
from jax.experimental import pallas as pl
from jax.experimental.pallas import tpu as pltpu


def _round_up(v, m):
    return ((v + m - 1) // m) * m


def _choose_view(total):
    """Pick a (rows, cols) 2-D view of the flat element stream.

    Prefer the widest cols in {512, 256, 128} with rows a multiple of 8
    (fully packed f32 sublanes); otherwise the widest cols that divides the
    total; otherwise a degenerate (1, total) view (ragged total).
    """
    best = None
    for c in (512, 256, 128):
        if total % c != 0:
            continue
        r = total // c
        if r % 8 == 0:
            return r, c
        if best is None:
            best = (r, c)
    if best is not None:
        return best
    return 1, total


def _sqsum_kernel(x_ref, y_ref, o_ref, acc_ref, *,
                  rows, cols, tr, tc, mask_rows, mask_lanes):
    i = pl.program_id(0)   # row-tile index
    j = pl.program_id(1)   # lane-tile index
    ni = pl.num_programs(0)
    nj = pl.num_programs(1)

    @pl.when(jnp.logical_and(i == 0, j == 0))
    def _():
        acc_ref[...] = jnp.zeros_like(acc_ref)

    d = x_ref[...].astype(jnp.float32) - y_ref[...].astype(jnp.float32)
    sq = d * d

    def accumulate(vals):
        if tr % 8 == 0 and tr > 8:
            # Fold sublane groups of 8: pure elementwise vreg adds (VALU only,
            # no cross-lane/XLU work, few stores) into the (8, tc) accumulator.
            vals = jnp.sum(vals.reshape(tr // 8, 8, tc), axis=0)
        acc_ref[...] += vals

    if mask_rows or mask_lanes:
        if mask_rows and mask_lanes:
            is_edge = jnp.logical_or(i == ni - 1, j == nj - 1)
        elif mask_rows:
            is_edge = i == ni - 1
        else:
            is_edge = j == nj - 1

        @pl.when(is_edge)
        def _():
            m = None
            if mask_rows:
                r = jax.lax.broadcasted_iota(jnp.int32, (tr, tc), 0)
                m = (i * tr + r) < rows
            if mask_lanes:
                lane = jax.lax.broadcasted_iota(jnp.int32, (tr, tc), 1)
                ml = (j * tc + lane) < cols
                m = ml if m is None else jnp.logical_and(m, ml)
            accumulate(jnp.where(m, sq, 0.0))

        @pl.when(jnp.logical_not(is_edge))
        def _():
            accumulate(sq)
    else:
        accumulate(sq)

    @pl.when(jnp.logical_and(i == ni - 1, j == nj - 1))
    def _():
        # Single cross-lane/sublane reduce for the whole kernel.
        s = jnp.sum(acc_ref[...])
        o_ref[...] = jnp.full((8, 128), s, dtype=jnp.float32)


def rmse_loss(x, y, *, eps=1e-8, target_block_bytes=2 * 1024 * 1024):
    """sqrt(mean((x - y)^2) + eps); x, y same shape, any rank >= 1."""
    assert x.shape == y.shape, (x.shape, y.shape)
    total = math.prod(x.shape)
    rows, cols = _choose_view(total)
    xf = x.reshape(rows, cols)        # keep original dtype; cast in-kernel
    yf = y.reshape(rows, cols)
    itemsize = jnp.dtype(x.dtype).itemsize

    if rows > 1:
        # Main path: full-width (contiguous) blocks, tile along rows only.
        tr = max(8, (target_block_bytes // (cols * itemsize)) // 8 * 8)
        if tr >= rows:
            tr = rows                  # whole row extent in one tile
        tc = cols
    else:
        # Degenerate fallback (total not a multiple of 128): single logical
        # row, tile along lanes with a lane mask on the ragged edge.
        tr = 1
        lane_cap = max(128, (262144 // itemsize) // 128 * 128)  # ~256 KiB/block
        tc = min(_round_up(cols, 128), lane_cap)
        if tc >= cols:
            tc = cols

    grid = (pl.cdiv(rows, tr), pl.cdiv(cols, tc))
    mask_rows = (grid[0] * tr) > rows
    mask_lanes = (grid[1] * tc) > cols
    acc_rows = 8 if (tr % 8 == 0) else tr

    kernel = functools.partial(
        _sqsum_kernel, rows=rows, cols=cols, tr=tr, tc=tc,
        mask_rows=mask_rows, mask_lanes=mask_lanes)

    partials = pl.pallas_call(
        kernel,
        out_shape=jax.ShapeDtypeStruct((8, 128), jnp.float32),
        grid_spec=pltpu.PrefetchScalarGridSpec(
            num_scalar_prefetch=0,
            grid=grid,
            in_specs=[
                pl.BlockSpec((tr, tc), lambda i, j: (i, j)),
                pl.BlockSpec((tr, tc), lambda i, j: (i, j)),
            ],
            out_specs=pl.BlockSpec((8, 128), lambda i, j: (0, 0)),
            scratch_shapes=[pltpu.VMEM((acc_rows, tc), jnp.float32)],
        ),
        compiler_params=pltpu.CompilerParams(
            dimension_semantics=("arbitrary", "arbitrary"),
        ),
    )(xf, yf)

    mse = partials[0, 0] / jnp.float32(total)
    return jnp.sqrt(mse + jnp.float32(eps))


def _rmse_ref(x, y, eps=1e-8):
    d = x.astype(jnp.float32) - y.astype(jnp.float32)
    return jnp.sqrt(jnp.mean(d * d) + eps)


if __name__ == "__main__":
    key = jax.random.PRNGKey(0)
    kx, ky = jax.random.split(key)
    # Small NCHW-like inputs consistent with the module's forward.
    x = jax.random.normal(kx, (2, 4, 16, 16), dtype=jnp.float32)
    y = jax.random.normal(ky, (2, 4, 16, 16), dtype=jnp.float32)

    out = jax.block_until_ready(rmse_loss(x, y))
    ref = jax.block_until_ready(_rmse_ref(x, y))
    assert jnp.allclose(out, ref, rtol=1e-5, atol=1e-6), (out, ref)

    print("KERNEL_OK")
</pallas_src>

<mosaic_0001>
module attributes {stable_mosaic.version = 11 : i64} {
  func.func @_sqsum_kernel(%arg0: i32, %arg1: i32, %arg2: memref<8x256xf32, #tpu.memory_space<vmem>>, %arg3: memref<8x256xf32, #tpu.memory_space<vmem>>, %arg4: memref<8x128xf32, #tpu.memory_space<vmem>>, %arg5: memref<8x256xf32, #tpu.memory_space<vmem>>) attributes {dimension_semantics = [#tpu.dimension_semantics<arbitrary>, #tpu.dimension_semantics<arbitrary>], iteration_bounds = array<i64: 1, 1>, scalar_prefetch = 0 : i64, scratch_operands = 1 : i64, tpu.core_type = #tpu.core_type<tc>, window_params = [{transform_indices = @transform_0, window_bounds = array<i64: 8, 256>}, {transform_indices = @transform_1, window_bounds = array<i64: 8, 256>}, {pipeline_mode = #tpu.pipeline_mode<synchronous>, transform_indices = @transform_2, window_bounds = array<i64: 8, 128>}]} {
    %c0_i32 = arith.constant 0 : i32
    %0 = arith.cmpi eq, %arg0, %c0_i32 : i32
    %c0_i32_0 = arith.constant 0 : i32
    %1 = arith.cmpi eq, %arg1, %c0_i32_0 : i32
    %2 = arith.andi %0, %1 : i1
    %3 = arith.extui %2 : i1 to i32
    %c0_i32_1 = arith.constant 0 : i32
    %4 = arith.cmpi ne, %3, %c0_i32_1 : i32
    scf.if %4 {
      %cst = arith.constant 0.000000e+00 : f32
      %17 = vector.broadcast %cst : f32 to vector<8x256xf32>
      %c0_12 = arith.constant 0 : index
      %c0_13 = arith.constant 0 : index
      %18 = vector.load %arg5[%c0_12, %c0_13] : memref<8x256xf32, #tpu.memory_space<vmem>>, vector<8x256xf32>
      tpu.vector_store %arg5[%c0_12, %c0_13], %17 {strides = array<i32>} : memref<8x256xf32, #tpu.memory_space<vmem>>, vector<8x256xf32>,
    } else {
    }
    %c0 = arith.constant 0 : index
    %c0_2 = arith.constant 0 : index
    %5 = vector.load %arg2[%c0, %c0_2] : memref<8x256xf32, #tpu.memory_space<vmem>>, vector<8x256xf32>
    %c0_3 = arith.constant 0 : index
    %c0_4 = arith.constant 0 : index
    %6 = vector.load %arg3[%c0_3, %c0_4] : memref<8x256xf32, #tpu.memory_space<vmem>>, vector<8x256xf32>
    %7 = arith.subf %5, %6 : vector<8x256xf32>
    %8 = arith.mulf %7, %7 : vector<8x256xf32>
    %c0_5 = arith.constant 0 : index
    %c0_6 = arith.constant 0 : index
    %9 = vector.load %arg5[%c0_5, %c0_6] : memref<8x256xf32, #tpu.memory_space<vmem>>, vector<8x256xf32>
    %10 = arith.addf %9, %8 : vector<8x256xf32>
    %c0_7 = arith.constant 0 : index
    %c0_8 = arith.constant 0 : index
    %11 = vector.load %arg5[%c0_7, %c0_8] : memref<8x256xf32, #tpu.memory_space<vmem>>, vector<8x256xf32>
    tpu.vector_store %arg5[%c0_7, %c0_8], %10 {strides = array<i32>} : memref<8x256xf32, #tpu.memory_space<vmem>>, vector<8x256xf32>,
    %c0_i32_9 = arith.constant 0 : i32
    %12 = arith.cmpi eq, %arg0, %c0_i32_9 : i32
    %c0_i32_10 = arith.constant 0 : i32
    %13 = arith.cmpi eq, %arg1, %c0_i32_10 : i32
    %14 = arith.andi %12, %13 : i1
    %15 = arith.extui %14 : i1 to i32
    %c0_i32_11 = arith.constant 0 : i32
    %16 = arith.cmpi ne, %15, %c0_i32_11 : i32
    scf.if %16 {
      %c0_12 = arith.constant 0 : index
      %c0_13 = arith.constant 0 : index
      %17 = vector.load %arg5[%c0_12, %c0_13] : memref<8x256xf32, #tpu.memory_space<vmem>>, vector<8x256xf32>
      %18 = vector.shape_cast %17 : vector<8x256xf32> to vector<1x8x256xf32>
      %cst = arith.constant dense<0.000000e+00> : vector<1xf32>
      %19 = vector.multi_reduction <add>, %18, %cst [1, 2] : vector<1x8x256xf32> to vector<1xf32>
      %20 = vector.shape_cast %19 : vector<1xf32> to vector<1x1x1xf32>
      %21 = vector.extract %20[0, 0, 0] : f32 from vector<1x1x1xf32>
      %22 = vector.broadcast %21 : f32 to vector<8x128xf32>
      %c0_14 = arith.constant 0 : index
      %c0_15 = arith.constant 0 : index
      %23 = vector.load %arg4[%c0_14, %c0_15] : memref<8x128xf32, #tpu.memory_space<vmem>>, vector<8x128xf32>
      tpu.vector_store %arg4[%c0_14, %c0_15], %22 {strides = array<i32>} : memref<8x128xf32, #tpu.memory_space<vmem>>, vector<8x128xf32>,
    } else {
    }
    return
  }
  func.func @transform_0(%arg0: i32, %arg1: i32) -> (i32, i32) {
    %c0_i32 = arith.constant 0 : i32
    return %arg0, %arg1 : i32, i32
  }
  func.func @transform_1(%arg0: i32, %arg1: i32) -> (i32, i32) {
    %c0_i32 = arith.constant 0 : i32
    return %arg0, %arg1 : i32, i32
  }
  func.func @transform_2(%arg0: i32, %arg1: i32) -> (i32, i32) {
    %c0_i32 = arith.constant 0 : i32
    %c0_i32_0 = arith.constant 0 : i32
    %c0_i32_1 = arith.constant 0 : i32
    return %c0_i32, %c0_i32_0 : i32, i32
  }
}

</mosaic_0001>

<bundles_post_ra>
// kernel: tpu_custom_call.1
= control target key start
LH: loop header
LB: loop body
LE: loop exit
PB: predicated region body
PF: predicated region fallthrough
CT: control target
= control target key end

     0   :  { %7 = vsyncpa [#allocation4], 0  ;;  %s206_s0 = inlined_call_operand.hbm [shape: f32[8,256], index: 0, kind: input, shape index: {}]   ;;  %s207_s1 = inlined_call_operand.hbm [shape: f32[8,256], index: 1, kind: input, shape index: {}]   ;;  %s208_s2 = inlined_call_operand.hbm [shape: f32[8,128], index: 2, kind: output, shape index: {}]  }
   0x1   :  { %8 = vsyncpa [#allocation7], 0 }
   0x2   :  { %9 = vsyncpa [#allocation5], 0  ;;  %s15_s11 = sshll.u32 %s206_s0, 4  ;;  %s179_s12 = smov [#allocation3]   ;;  %s16_s11 = int_to_ptr.hbm [resolvable:$true] %s15_s11 }
   0x3   :  { %s17_s13 = sshll.u32 %s179_s12, 4  ;;  %s26_s16 = sshll.u32 %s207_s1, 4  ;;  %s18_s13 = int_to_ptr.vmem [resolvable:$true] %s17_s13  ;;  %s27_s16 = int_to_ptr.hbm [resolvable:$true] %s26_s16 }
   0x4   :  { %20 = dma.hbm_to_vmem [thread:$0]  %s16_s11, 256, %s18_s13, [#allocation4]  }
   0x5   :  { %s180_s17 = smov [#allocation6]  }
   0x6   :  { %s28_s18 = sshll.u32 %s180_s17, 4  ;;  %s29_s18 = int_to_ptr.vmem [resolvable:$true] %s28_s18 }
   0x7   :  { %31 = dma.hbm_to_vmem [thread:$0]  %s27_s16, 256, %s29_s18, [#allocation7]  }
   0x8   :  { %173 = dma.done.wait [#allocation4], 256  }
   0x9   :  { %174 = vsyncadd [#allocation4], 4294967040 }
   0xa   :  { %175 = dma.done.wait [#allocation7], 256  }
   0xb   :  { %176 = vsyncadd [#allocation7], 4294967040  ;;  %v48_v0 = vld [vmem:[#allocation3] sm:$0xff]  ;;  %v49_v1 = vld [vmem:[#allocation3 + $0x8] sm:$0xff]  ;;  %s181_s0 = smov [#allocation8]   ;;  %s85_s21 = sshll.u32 %s208_s2, 4  ;;  %s86_s21 = int_to_ptr.hbm [resolvable:$true] %s85_s21 }
   0xc   :  { %v50_v2 = vld [vmem:[#allocation6] sm:$0xff]  ;;  %v51_v3 = vld [vmem:[#allocation6 + $0x8] sm:$0xff]  ;;  %s83_s1 = sshll.u32 %s181_s0, 4  ;;  %s84_s1 = int_to_ptr.vmem [resolvable:$true] %s83_s1 }
   0xd   :  { %v52_v4 = vsub.f32 %v48_v0, %v50_v2  ;;  %v53_v5 = vsub.f32 %v49_v1, %v51_v3 }
   0xf   :  { %v54_v6 = vmul.f32 %v52_v4, %v52_v4  ;;  %v55_v7 = vmul.f32 %v53_v5, %v53_v5 }
  0x11   :  { %v66_v8 = vadd.f32 %v55_v7, %v54_v6 }
  0x13   :  { %67 = vadd.xlane.f32.xlu0 %v66_v8 }
  0x86   :  { %v68_v9 = vpop.xlane.xlu0 %67 }
  0x87   :  { %v69_v10 = vrot.slane %v68_v9, 4 }
  0x89   :  { %v70_v11 = vadd.f32 %v69_v10, %v68_v9 }
  0x8b   :  { %v71_v12 = vrot.slane %v70_v11, 2 }
  0x8d   :  { %v72_v13 = vadd.f32 %v71_v12, %v70_v11 }
  0x8f   :  { %v73_v14 = vrot.slane %v72_v13, 1 }
  0x91   :  { %v74_v15 = vadd.f32 %v73_v14, %v72_v13 }
  0x93   :  { %96 = vpush %v74_v15 }
  0xc4   :  { %s97_s22 = spop %96 }
  0xc5   :  { %v76_v16 = vstv %s97_s22 }
  0xc6   :  { %77 = vst [vmem:[#allocation8] sm:$0xff] %v76_v16 }
  0xc7   :  { %88 = dma.vmem_to_hbm [thread:$0]  %s84_s1, 128, %s86_s21, [#allocation5]  }
  0xc8   :  { %177 = dma.done.wait [#allocation5], 128  }
  0xc9   :  { %178 = vsyncadd [#allocation5], 4294967168 }
  0xca   :  { %93 = vsyncpa [#allocation4], 1 }
  0xcb   :  { %94 = vsyncpa [#allocation7], 1 }
  0xcc   :  { %95 = vsyncpa [#allocation5], 1 }

</bundles_post_ra>
